<compile_context>
chip_gen: v7x
topology: tpu7x:2x2x1
jax: 0.10.0
libtpu: 0.0.40
codegen_flags: <defaults>
</compile_context>

<pallas_src>
import jax
import jax.numpy as jnp
from jax.experimental import pallas as pl
from jax.experimental.pallas import tpu as pltpu


def _round_up(a, m):
    return ((a + m - 1) // m) * m


def linear_kernel(x_ref, w_ref, b_ref, o_ref):
    # x_ref: (block_rows, 384) VMEM -- 128 samples per row, features interleaved along lanes
    # w_ref: (384, 128)        VMEM -- constant: column j sums the 3 features of sample j,
    #                                  pre-scaled by the nn.Linear weights
    # b_ref: (1, 1)            SMEM -- bias scalar
    # o_ref: (block_rows, 128) VMEM -- lane-dense output; sample r*128+j lands at (r, j)
    acc = jnp.dot(x_ref[...], w_ref[...], preferred_element_type=jnp.float32)
    o_ref[...] = (acc + b_ref[0, 0]).astype(o_ref.dtype)


def shared_fc_forward(x, weight, bias, *, max_block_rows=2048):
    """y = x @ weight.T + bias, exactly nn.Linear(3, 1) semantics."""
    B_, F_in = x.shape
    F_out, F_in_w = weight.shape
    assert F_in_w == F_in and F_out == 1 and bias.shape == (1,)

    LANES = 128
    CHUNK = LANES * F_in                      # 384 floats = 128 samples per flat row

    # Pad batch to a multiple of 128 samples (lane width). Copies only when unaligned;
    # prefer a 128-aligned batch from the producer to keep this a no-op.
    b_pad = _round_up(B_, LANES)
    if b_pad != B_:
        x = jnp.pad(x, ((0, b_pad - B_), (0, 0)))
    rows = b_pad // LANES

    # Free, flat-order-preserving view (no transpose, no extra HBM pass).
    x_view = x.reshape(rows, CHUNK)

    # Constant (384, 128) grouping+weight matrix:
    #   w_big[c, j] = weight[c % 3] if (c // 3) == j else 0
    c = jnp.arange(CHUNK)
    j = jnp.arange(LANES)
    w_flat = weight.reshape(F_in).astype(jnp.float32)
    w_big = jnp.where((c[:, None] // F_in) == j[None, :],
                      w_flat[c % F_in][:, None],
                      jnp.float32(0.0)).astype(x.dtype)
    b_smem = bias.reshape(1, 1).astype(jnp.float32)

    # Tile selection: aim for ~8 grid steps (megacore sharding), cap the tile so the
    # double-buffered footprint (~4.2 KiB per row) stays well under every scoped default.
    block_rows = max(8, min(max_block_rows, _round_up(pl.cdiv(rows, 8), 8)))
    if block_rows > rows:
        block_rows = rows                     # small batch: one full block (grid = 1)
    grid = (pl.cdiv(rows, block_rows),)

    out = pl.pallas_call(
        linear_kernel,
        out_shape=jax.ShapeDtypeStruct((rows, LANES), x.dtype),
        grid=grid,
        in_specs=[
            pl.BlockSpec((block_rows, CHUNK), lambda i: (i, 0)),      # lane-dense x tile
            pl.BlockSpec((CHUNK, LANES), lambda i: (0, 0)),           # resident weight matrix
            pl.BlockSpec(memory_space=pltpu.MemorySpace.SMEM),        # bias scalar
        ],
        out_specs=pl.BlockSpec((block_rows, LANES), lambda i: (i, 0)),
        compiler_params=pltpu.CompilerParams(
            dimension_semantics=("parallel",),    # batch tiles shard across v7x's 2 TCs
        ),
        cost_estimate=pl.CostEstimate(
            flops=6 * b_pad, transcendentals=0, bytes_accessed=16 * b_pad),
    )(x_view, w_big, b_smem)

    y = out.reshape(b_pad, F_out)             # flat-order no-op back to nn.Linear's (B, 1)
    if b_pad != B_:
        y = y[:B_]
    return y


if __name__ == "__main__":
    key = jax.random.PRNGKey(0)

    # Deterministic parameters matching B.__init__: weight = ones([1,3]), bias = ones([1]).
    weight = jnp.ones((1, 3), dtype=jnp.float32)
    bias = jnp.ones((1,), dtype=jnp.float32)

    # Small demo shape consistent with the module: batch=8, in_features=3.
    x = jax.random.normal(key, (8, 3), dtype=jnp.float32)
    out = jax.block_until_ready(shared_fc_forward(x, weight, bias))
    ref = x @ weight.T + bias
    assert out.shape == (8, 1)
    assert jnp.allclose(out, ref, atol=1e-5, rtol=1e-5)

    # Multi-tile, lane-aligned path: rows=32 -> block_rows=8, grid=4 (megacore-shardable).
    x2 = jax.random.normal(jax.random.PRNGKey(1), (4096, 3), dtype=jnp.float32)
    out2 = jax.block_until_ready(shared_fc_forward(x2, weight, bias))
    ref2 = x2 @ weight.T + bias
    assert out2.shape == (4096, 1)
    assert jnp.allclose(out2, ref2, atol=1e-5, rtol=1e-5)

    # Unaligned batch: exercises the 128-sample pad + output slice path.
    x3 = jax.random.normal(jax.random.PRNGKey(2), (200, 3), dtype=jnp.float32)
    out3 = jax.block_until_ready(shared_fc_forward(x3, weight, bias))
    ref3 = x3 @ weight.T + bias
    assert out3.shape == (200, 1)
    assert jnp.allclose(out3, ref3, atol=1e-5, rtol=1e-5)

    print("KERNEL_OK")
</pallas_src>

<mosaic_0001>
module attributes {stable_mosaic.version = 11 : i64} {
  func.func @linear_kernel(%arg0: i32, %arg1: memref<1x384xf32, #tpu.memory_space<vmem>>, %arg2: memref<384x128xf32, #tpu.memory_space<vmem>>, %arg3: memref<1x1xf32, #tpu.memory_space<smem>>, %arg4: memref<1x128xf32, #tpu.memory_space<vmem>>) attributes {dimension_semantics = [#tpu.dimension_semantics<parallel>], iteration_bounds = array<i64: 1>, scalar_prefetch = 0 : i64, scratch_operands = 0 : i64, tpu.core_type = #tpu.core_type<tc>, window_params = [{transform_indices = @transform_0, window_bounds = array<i64: 1, 384>}, {pipeline_mode = #tpu.pipeline_mode<synchronous>, transform_indices = @transform_1, window_bounds = array<i64: 384, 128>}, {transform_indices = @transform_2, window_bounds = array<i64: 1, 1>}, {transform_indices = @transform_3, window_bounds = array<i64: 1, 128>}]} {
    %c0 = arith.constant 0 : index
    %c0_0 = arith.constant 0 : index
    %0 = vector.load %arg1[%c0, %c0_0] : memref<1x384xf32, #tpu.memory_space<vmem>>, vector<1x384xf32>
    %c0_1 = arith.constant 0 : index
    %c0_2 = arith.constant 0 : index
    %1 = vector.load %arg2[%c0_1, %c0_2] : memref<384x128xf32, #tpu.memory_space<vmem>>, vector<384x128xf32>
    %cst = arith.constant dense<0.000000e+00> : vector<1x128xf32>
    %2 = tpu.matmul %0, %1, %cst {dimension_numbers = #tpu.dot_dimension_numbers<[1], [0], [0], [1], [0, 0, 1, 1], [], []>} : vector<1x384xf32>, vector<384x128xf32>, vector<1x128xf32> -> vector<1x128xf32>
    %c0_3 = arith.constant 0 : index
    %c0_4 = arith.constant 0 : index
    %3 = memref.load %arg3[%c0_3, %c0_4] : memref<1x1xf32, #tpu.memory_space<smem>>
    %4 = vector.broadcast %3 : f32 to vector<1x128xf32>
    %5 = arith.addf %2, %4 : vector<1x128xf32>
    %c0_5 = arith.constant 0 : index
    %c0_6 = arith.constant 0 : index
    %6 = vector.load %arg4[%c0_5, %c0_6] : memref<1x128xf32, #tpu.memory_space<vmem>>, vector<1x128xf32>
    tpu.vector_store %arg4[%c0_5, %c0_6], %5 {strides = array<i32>} : memref<1x128xf32, #tpu.memory_space<vmem>>, vector<1x128xf32>,
    return
  }
  func.func @transform_0(%arg0: i32) -> (i32, i32) {
    %c0_i32 = arith.constant 0 : i32
    %c0_i32_0 = arith.constant 0 : i32
    return %arg0, %c0_i32 : i32, i32
  }
  func.func @transform_1(%arg0: i32) -> (i32, i32) {
    %c0_i32 = arith.constant 0 : i32
    %c0_i32_0 = arith.constant 0 : i32
    %c0_i32_1 = arith.constant 0 : i32
    return %c0_i32, %c0_i32_0 : i32, i32
  }
  func.func @transform_2(%arg0: i32) -> (i32, i32) {
    %c0_i32 = arith.constant 0 : i32
    %c0_i32_0 = arith.constant 0 : i32
    %c0_i32_1 = arith.constant 0 : i32
    return %c0_i32, %c0_i32_0 : i32, i32
  }
  func.func @transform_3(%arg0: i32) -> (i32, i32) {
    %c0_i32 = arith.constant 0 : i32
    %c0_i32_0 = arith.constant 0 : i32
    return %arg0, %c0_i32 : i32, i32
  }
}

</mosaic_0001>

<bundles_post_ra>
// kernel: tpu_custom_call.1
= control target key start
LH: loop header
LB: loop body
LE: loop exit
PB: predicated region body
PF: predicated region fallthrough
CT: control target
= control target key end

     0   :  { %9 = vsyncpa [#allocation4], 0  ;;  %s521_s0 = inlined_call_operand.vmem [shape: f32[1,384], index: 0, kind: input, shape index: {}]   ;;  %s522_s1 = inlined_call_operand.hbm [shape: f32[384,128], index: 1, kind: input, shape index: {}]   ;;  %s523_s2 = inlined_call_operand.<no memory space> [shape: f32[1,1], index: 2, kind: input, shape index: {}]   ;;  %s524_s3 = inlined_call_operand.hbm [shape: f32[1,128], index: 3, kind: output, shape index: {}]  }
   0x1   :  { %10 = vsyncpa [#allocation5], 0  ;;  %s451_s12 = smov [#allocation3]   ;;  %s403_s16 = scalar_lea.hbm %s522_s1, 6144 }
   0x2   :  { %s18_s13 = sshll.u32 %s451_s12, 4  ;;  %p404_p0 = scmp.ne.s32.totalorder %s522_s1, %s403_s16  ;;  %s19_s13 = int_to_ptr.vmem [resolvable:$true] %s18_s13 }
   0x3   :  { %p407_p1 = scmp.lt.u32.totalorder %s403_s16, %s522_s1 }
   0x5   :  { %p409_p2 = pnand %p407_p1, %p404_p0 }
   0x7   :  { %412 = shalt.err (!%p409_p2)
}
   0x8   :  { %s413_s21 = scalar_lea.vmem %s19_s13, 6144  ;;  %p418_p4 = scmp.lt.s32.totalorder %s19_s13, %s19_s13 }
   0x9   :  { %p414_p3 = scmp.ne.s32.totalorder %s19_s13, %s413_s21  ;;  %p419_p5 = scmp.lt.s32.totalorder %s413_s21, %s413_s21 }
   0xb   :  { %p420_p6 = por %p419_p5, %p418_p4 }
   0xd   :  { %p421_p7 = pnand %p420_p6, %p414_p3 }
   0xf   :  { %424 = shalt.err (!%p421_p7)
}
  0x10   :  { %s452_s22 = smov 128   ;;  %s453_s23 = smov 8  }
  0x11   :  { %24 = dma.hbm_to_vmem [thread:$0]  %s522_s1, 6144, %s19_s13, [#allocation4], %s452_s22, %s452_s22, %s453_s23  }
  0x12   :  { %447 = dma.done.wait [#allocation4], 6144  }
  0x13   :  { %448 = vsyncadd [#allocation4], 4294961152  ;;  %v454_v0 = vmov 0.0|0.0   ;;  %vm455_vm0 = vmmov 0   ;;  %v456_v1 = vmov 0.0   ;;  %v47_v2 = vld [vmem:[#allocation3 + $0x80] sm:$0xff]  ;;  %v82_v20 = vlaneseq }
  0x14   :  { %372 = vmatprep.subr.bf16.mxu1 %v454_v0  ;;  %337 = vmatprep.mubr.msk.f32.mxu1 %vm455_vm0, %v456_v1  ;;  %v48_v3 = vld [vmem:[#allocation3 + $0x88] sm:$0xff]  ;;  %v31_v4 = vld [vmem:[#allocation3] sm:$0xff]  ;;  %v49_v7 = vld [vmem:[#allocation3 + $0x90] sm:$0xff]  ;;  %s457_s28 = smov [#allocation6]  }
  0x15   :  { %v340_v5 = vpack.c.bf16 %v48_v3, %v47_v2  ;;  %v32_v6 = vld [vmem:[#allocation3 + $0x8] sm:$0xff]  ;;  %v50_v8 = vld [vmem:[#allocation3 + $0x98] sm:$0xff]  ;;  %v33_v11 = vld [vmem:[#allocation3 + $0x10] sm:$0xff]  ;;  %v492_v31 = vshrl.u32 %v82_v20, 7  ;;  %s244_s29 = sshll.u32 %s457_s28, 4  ;;  %s245_s29 = int_to_ptr.vmem [resolvable:$true] %s244_s29 }
  0x16   :  { %v342_v9 = vpack.c.bf16 %v32_v6, %v31_v4  ;;  %v344_v10 = vpack.c.bf16 %v50_v8, %v49_v7  ;;  %v34_v12 = vld [vmem:[#allocation3 + $0x18] sm:$0xff]  ;;  %v63_v13 = vld [vmem:[#allocation3 + $0x100] sm:$0xff]  ;;  %v64_v14 = vld [vmem:[#allocation3 + $0x108] sm:$0xff]  ;;  %s425_s30 = scalar_lea.vmem %s245_s29, 16  ;;  %s429_s4 = scalar_lea.vmem %s245_s29, 32 }
  0x17   :  { %341 = vmatprep.subr.bf16.mxu0 %v340_v5  ;;  %v51_v15 = vld [vmem:[#allocation3 + $0xa0] sm:$0xff]  ;;  %v52_v16 = vld [vmem:[#allocation3 + $0xa8] sm:$0xff]  ;;  %v346_v17 = vpack.c.bf16 %v34_v12, %v33_v11  ;;  %v373_v18 = vpack.c.bf16 %v64_v14, %v63_v13  ;;  %v65_v19 = vld [vmem:[#allocation3 + $0x110] sm:$0xff]  ;;  %v88_v41 = vsub.s32 1, %v492_v31  ;;  %v84_v12 = vsub.s32 0, %v492_v31  ;;  %p426_p8 = scmp.ne.s32.totalorder %s245_s29, %s425_s30  ;;  %p430_p9 = scmp.lt.s32.totalorder %s245_s29, %s245_s29 }
  0x18   :  { %343 = vmatpush3.bf16.msra.mxu0 %v342_v9  ;;  %v348_v21 = vpack.c.bf16 %v52_v16, %v51_v15  ;;  %v35_v22 = vld [vmem:[#allocation3 + $0x20] sm:$0xff]  ;;  %v36_v23 = vld [vmem:[#allocation3 + $0x28] sm:$0xff]  ;;  %v66_v24 = vld [vmem:[#allocation3 + $0x118] sm:$0xff]  ;;  %v92_v16 = vsub.s32 2, %v492_v31  ;;  %p431_p10 = scmp.lt.s32.totalorder %s429_s4, %s425_s30 }
  0x19   :  { %345 = vmatprep.subr.bf16.mxu0 %v344_v10  ;;  %374 = vmatpush3.bf16.msra.mxu1 %v373_v18  ;;  %v376_v25 = vpack.c.bf16 %v66_v24, %v65_v19  ;;  %v53_v26 = vld [vmem:[#allocation3 + $0xb0] sm:$0xff]  ;;  %v54_v27 = vld [vmem:[#allocation3 + $0xb8] sm:$0xff]  ;;  %v67_v28 = vld [vmem:[#allocation3 + $0x120] sm:$0xff]  ;;  %v350_v30 = vpack.c.bf16 %v36_v23, %v35_v22  ;;  %v80_v22 = vstv %s523_s2 }
  0x1a   :  { %375 = vmatprep.subr.bf16.mxu1 %v454_v0  ;;  %v68_v29 = vld [vmem:[#allocation3 + $0x128] sm:$0xff]  ;;  %v352_v32 = vpack.c.bf16 %v54_v27, %v53_v26  ;;  %v37_v33 = vld [vmem:[#allocation3 + $0x30] sm:$0xff]  ;;  %v38_v34 = vld [vmem:[#allocation3 + $0x38] sm:$0xff]  ;;  %p432_p11 = por %p431_p10, %p430_p9 }
  0x1b   :  { %v379_v35 = vpack.c.bf16 %v68_v29, %v67_v28  ;;  %v55_v36 = vld [vmem:[#allocation3 + $0xc0] sm:$0xff]  ;;  %v56_v37 = vld [vmem:[#allocation3 + $0xc8] sm:$0xff]  ;;  %v69_v38 = vld [vmem:[#allocation3 + $0x130] sm:$0xff]  ;;  %v354_v40 = vpack.c.bf16 %v38_v34, %v37_v33 }
  0x1c   :  { %347 = vmatpush3.bf16.msra.mxu0 %v346_v17  ;;  %v70_v39 = vld [vmem:[#allocation3 + $0x138] sm:$0xff]  ;;  %v356_v42 = vpack.c.bf16 %v56_v37, %v55_v36  ;;  %v39_v43 = vld [vmem:[#allocation3 + $0x40] sm:$0xff]  ;;  %v40_v44 = vld [vmem:[#allocation3 + $0x48] sm:$0xff]  ;;  %p433_p12 = pnand %p432_p11, %p426_p8 }
  0x1d   :  { %349 = vmatprep.subr.bf16.mxu0 %v348_v21  ;;  %377 = vmatpush3.bf16.msra.mxu1 %v376_v25  ;;  %v382_v45 = vpack.c.bf16 %v70_v39, %v69_v38  ;;  %v57_v46 = vld [vmem:[#allocation3 + $0xd0] sm:$0xff]  ;;  %v58_v47 = vld [vmem:[#allocation3 + $0xd8] sm:$0xff]  ;;  %v71_v48 = vld [vmem:[#allocation3 + $0x140] sm:$0xff]  ;;  %v358_v51 = vpack.c.bf16 %v40_v44, %v39_v43 }
  0x1e   :  { %378 = vmatprep.subr.bf16.mxu1 %v454_v0  ;;  %v72_v49 = vld [vmem:[#allocation3 + $0x148] sm:$0xff]  ;;  %v30_v50 = vld [vmem:[%s521_s0] sm:$0x7]  ;;  %v360_v53 = vpack.c.bf16 %v58_v47, %v57_v46  ;;  %v41_v54 = vld [vmem:[#allocation3 + $0x50] sm:$0xff] }
  0x1f   :  { %v89_v52 = vrot.slane %v30_v50, %v88_v41  ;;  %v42_v55 = vld [vmem:[#allocation3 + $0x58] sm:$0xff]  ;;  %v385_v56 = vpack.c.bf16 %v72_v49, %v71_v48  ;;  %v59_v57 = vld [vmem:[#allocation3 + $0xe0] sm:$0xff]  ;;  %v60_v58 = vld [vmem:[#allocation3 + $0xe8] sm:$0xff]  ;;  %v85_v18 = vrot.slane %v30_v50, %v84_v12  ;;  %v93_v19 = vrot.slane %v30_v50, %v92_v16 }
  0x20   :  { %351 = vmatpush3.bf16.msra.mxu0 %v350_v30  ;;  %v73_v59 = vld [vmem:[#allocation3 + $0x150] sm:$0xff]  ;;  %v74_v60 = vld [vmem:[#allocation3 + $0x158] sm:$0xff]  ;;  %v362_v61 = vpack.c.bf16 %v42_v55, %v41_v54  ;;  %v364_v62 = vpack.c.bf16 %v60_v58, %v59_v57  ;;  %v43_v63 = vld [vmem:[#allocation3 + $0x60] sm:$0xff] }
  0x21   :  { %353 = vmatprep.subr.bf16.mxu0 %v352_v32  ;;  %380 = vmatpush3.bf16.msra.mxu1 %v379_v35  ;;  %v44_v1 = vld [vmem:[#allocation3 + $0x68] sm:$0xff]  ;;  %v388_v2 = vpack.c.bf16 %v74_v60, %v73_v59  ;;  %v61_v3 = vld [vmem:[#allocation3 + $0xf0] sm:$0xff]  ;;  %v62_v4 = vld [vmem:[#allocation3 + $0xf8] sm:$0xff] }
  0x22   :  { %381 = vmatprep.subr.bf16.mxu1 %v454_v0  ;;  %161 = vmatprep.mubr.f32.mxu0 %v89_v52  ;;  %v75_v5 = vld [vmem:[#allocation3 + $0x160] sm:$0xff]  ;;  %v76_v6 = vld [vmem:[#allocation3 + $0x168] sm:$0xff]  ;;  %v366_v7 = vpack.c.bf16 %v44_v1, %v43_v63  ;;  %v368_v8 = vpack.c.bf16 %v62_v4, %v61_v3  ;;  %v45_v9 = vld [vmem:[#allocation3 + $0x70] sm:$0xff] }
  0x23   :  { %v46_v10 = vld [vmem:[#allocation3 + $0x78] sm:$0xff]  ;;  %v391_v11 = vpack.c.bf16 %v76_v6, %v75_v5  ;;  %v77_v13 = vld [vmem:[#allocation3 + $0x170] sm:$0xff] }
  0x24   :  { %355 = vmatpush3.bf16.msra.mxu0 %v354_v40  ;;  %v78_v14 = vld [vmem:[#allocation3 + $0x178] sm:$0xff]  ;;  %v370_v15 = vpack.c.bf16 %v46_v10, %v45_v9 }
  0x25   :  { %357 = vmatprep.subr.bf16.mxu0 %v356_v42  ;;  %383 = vmatpush3.bf16.msra.mxu1 %v382_v45  ;;  %v394_v17 = vpack.c.bf16 %v78_v14, %v77_v13 }
  0x26   :  { %384 = vmatprep.subr.bf16.mxu1 %v454_v0 }
  0x28   :  { %359 = vmatpush3.bf16.msra.mxu0 %v358_v51 }
  0x29   :  { %361 = vmatprep.subr.bf16.mxu0 %v360_v53  ;;  %386 = vmatpush3.bf16.msra.mxu1 %v385_v56 }
  0x2a   :  { %387 = vmatprep.subr.bf16.mxu1 %v454_v0 }
  0x2c   :  { %363 = vmatpush3.bf16.msra.mxu0 %v362_v61 }
  0x2d   :  { %365 = vmatprep.subr.bf16.mxu0 %v364_v62  ;;  %389 = vmatpush3.bf16.msra.mxu1 %v388_v2 }
  0x2e   :  { %390 = vmatprep.subr.bf16.mxu1 %v454_v0 }
  0x30   :  { %367 = vmatpush3.bf16.msra.mxu0 %v366_v7 }
  0x31   :  { %369 = vmatprep.subr.bf16.mxu0 %v368_v8  ;;  %392 = vmatpush3.bf16.msra.mxu1 %v391_v11 }
  0x32   :  { %393 = vmatprep.subr.bf16.mxu1 %v454_v0 }
  0x34   :  { %371 = vmatpush3.bf16.msra.mxu0 %v370_v15 }
  0x35   :  { %395 = vmatpush3.bf16.msra.mxu1 %v394_v17 }
  0x37   :  { %162 = vmatmul.mubr.f32.vlgmr.msra.gmra.mrb[0].mxu0 %v85_v18 }
  0x38   :  { %338 = vmatmul.mubr.f32.vlgmr.msra.gmra.mrb[0].mxu1 %v93_v19 }
 0x10a   :  { %v285_v20 = vpop.f32.mrb[0].mxu0 }
 0x10b   :  { %v286_v21 = vpop.f32.mrb[1].mxu0  ;;  %v233_v24 = vpop.f32.mrb[0].mxu1 }
 0x10c   :  { %v287_v23 = vadd.f32 %v286_v21, %v285_v20  ;;  %v339_v25 = vpop.f32.mrb[1].mxu1 }
 0x10e   :  { %v164_v26 = vadd.f32 %v287_v23, %v80_v22 }
 0x110   :  { %v234_v27 = vadd.f32 %v233_v24, %v164_v26 }
 0x112   :  { %237 = vst [vmem:[#allocation6] sm:$0x1] %v234_v27 }
 0x113   :  { %436 = shalt.err (!%p433_p12)
}
 0x114   :  { %s437_s2 = scalar_lea.hbm %s524_s3, 16 }
 0x115   :  { %p438_p13 = scmp.ne.s32.totalorder %s524_s3, %s437_s2  ;;  %p441_p0 = scmp.lt.u32.totalorder %s437_s2, %s524_s3 }
 0x117   :  { %p443_p1 = pnand %p441_p0, %p438_p13 }
 0x119   :  { %446 = shalt.err (!%p443_p1)
}
 0x11a   :  { %247 = dma.vmem_to_hbm [thread:$0]  %s245_s29, 16, %s524_s3, [#allocation5]  }
 0x11b   :  { %449 = dma.done.wait [#allocation5], 16  }
 0x11c   :  { %450 = vsyncadd [#allocation5], 4294967280 }
 0x11d   :  { %251 = vsyncpa [#allocation4], 1 }
 0x11e   :  { %252 = vsyncpa [#allocation5], 1 }

</bundles_post_ra>
